<compile_context>
chip_gen: v5e
topology: v5e:2x2
jax: 0.10.0
libtpu: 0.0.40
codegen_flags: <defaults>
</compile_context>

<pallas_src>
import jax
import jax.numpy as jnp
from jax.experimental import pallas as pl
from jax.experimental.pallas import tpu as pltpu


def _round_up(v, m):
    return ((v + m - 1) // m) * m


def _node_to_bb_kernel(x_ref, batch_ref, w1_ref, b1_ref, w2_ref, b2_ref,
                       out_ref, max_sc, sum_sc, acc_sc):
    gb = pl.program_id(0)          # graph-block index   (parallel axis)
    nt = pl.program_id(1)          # node-tile index     (reduction axis, innermost)

    @pl.when(nt == 0)
    def _init():
        max_sc[...] = jnp.full(max_sc.shape, -jnp.inf, jnp.float32)
        sum_sc[...] = jnp.zeros(sum_sc.shape, jnp.float32)
        acc_sc[...] = jnp.zeros(acc_sc.shape, jnp.float32)

    x = x_ref[...]                                                    # [TN, Fp] native dtype

    # gate MLP: Linear(F,F) -> ReLU -> Linear(F,1); MXU matmul, f32 accumulation.
    h = jnp.dot(x, w1_ref[...], preferred_element_type=jnp.float32)   # [TN, Fp]
    h = jnp.maximum(h + b1_ref[...].astype(jnp.float32), 0.0)
    gate = (jnp.sum(h * w2_ref[...].astype(jnp.float32), axis=1, keepdims=True)
            + b2_ref[0, 0].astype(jnp.float32))                       # [TN, 1]

    tn = x.shape[0]
    gbs = acc_sc.shape[0]                                             # graphs per block

    # membership mask of this node tile against this graph block (tile-sized only).
    col_ids = gb * gbs + jax.lax.broadcasted_iota(jnp.int32, (tn, gbs), 1)
    mask = batch_ref[...] == col_ids                                  # [TN, GB] bool

    masked_gate = jnp.where(mask, gate, -jnp.inf)                     # [TN, GB]

    # online segment softmax across node tiles (flash style).
    old_max = max_sc[...]                                             # [1, GB]
    new_max = jnp.maximum(old_max, jnp.max(masked_gate, axis=0, keepdims=True))
    new_max_safe = jnp.where(new_max == -jnp.inf, 0.0, new_max)       # empty-segment guard
    p = jnp.exp(masked_gate - new_max_safe)                           # [TN, GB]; 0 where masked
    alpha = jnp.exp(old_max - new_max_safe)                           # [1, GB]; 0 on first hit

    # move per-graph row stats [1,GB] into column layout [GB,1] via a tiny eye mask
    # (avoids a cross-layout transpose; GBxGB is at most 64x64).
    eye = (jax.lax.broadcasted_iota(jnp.int32, (gbs, gbs), 0)
           == jax.lax.broadcasted_iota(jnp.int32, (gbs, gbs), 1)).astype(jnp.float32)
    alpha_col = jnp.sum(eye * alpha, axis=1, keepdims=True)           # [GB, 1]

    sum_sc[...] = alpha * sum_sc[...] + jnp.sum(p, axis=0, keepdims=True)
    # scatter_add as a matmul: acc[g, f] += sum_n p[n, g] * x[n, f]
    acc_sc[...] = alpha_col * acc_sc[...] + jax.lax.dot_general(
        p.astype(x.dtype), x, (((0,), (0,)), ((), ())),
        preferred_element_type=jnp.float32)                           # [GB, Fp]
    max_sc[...] = new_max

    @pl.when(nt == pl.num_programs(1) - 1)
    def _finalize():
        denom = jnp.sum(eye * (sum_sc[...] + 1e-16), axis=1, keepdims=True)   # [GB, 1]
        out_ref[...] = (acc_sc[...] / denom).astype(out_ref.dtype)


def node_to_basic_block_aggregate(x, batch, num_segments, params, *, node_tile=512):
    """x: [N, F] node features; batch: [N] int32 basic-block id per node (in
    [0, num_segments)); returns [num_segments, F] pooled embeddings."""
    w1, b1, w2, b2 = params
    n, f = x.shape
    dtype = x.dtype

    fp = _round_up(f, 128)                                   # lane-dense feature dim
    gbs = min(_round_up(max(num_segments, 1), 8), 64)        # graphs per output block
    g_pad = _round_up(max(num_segments, 1), gbs)
    n_gb = g_pad // gbs

    tn = min(_round_up(node_tile, 8), _round_up(n, 8))       # node tile (mult. of 8)
    n_pad = _round_up(n, tn)
    n_nt = n_pad // tn

    # pad: features -> fp (zeros), nodes -> n_pad (zero rows with out-of-range id).
    x_p = jnp.zeros((n_pad, fp), dtype).at[:n, :f].set(x)
    batch_p = jnp.full((n_pad, 1), g_pad, jnp.int32).at[:n, 0].set(batch.astype(jnp.int32))
    w1_p = jnp.zeros((fp, fp), dtype).at[:f, :f].set(w1.astype(dtype))
    b1_p = jnp.zeros((1, fp), dtype).at[:, :f].set(b1.astype(dtype))
    w2_p = jnp.zeros((1, fp), dtype).at[:, :f].set(w2.astype(dtype))
    b2_p = b2.reshape(1, 1).astype(jnp.float32)

    itemsize = jnp.dtype(dtype).itemsize
    cost = pl.CostEstimate(
        flops=int(n_gb * n_nt * (2 * tn * fp * fp + 2 * tn * gbs * fp)),
        transcendentals=int(n_gb * n_nt * tn * gbs),
        bytes_accessed=int(n_gb * n_nt * tn * (fp * itemsize + 4)
                           + fp * fp * itemsize + g_pad * fp * itemsize),
    )

    grid_spec = pltpu.PrefetchScalarGridSpec(
        num_scalar_prefetch=0,
        grid=(n_gb, n_nt),
        in_specs=[
            pl.BlockSpec((tn, fp), lambda g, t: (t, 0)),          # x node tile
            pl.BlockSpec((tn, 1), lambda g, t: (t, 0)),           # basic-block ids
            pl.BlockSpec((fp, fp), lambda g, t: (0, 0)),          # W1 (x @ W1 layout)
            pl.BlockSpec((1, fp), lambda g, t: (0, 0)),           # b1
            pl.BlockSpec((1, fp), lambda g, t: (0, 0)),           # Linear(F,1) weight row
            pl.BlockSpec(memory_space=pltpu.MemorySpace.SMEM),    # b2 scalar in SMEM
        ],
        out_specs=pl.BlockSpec((gbs, fp), lambda g, t: (g, 0)),   # resident across node tiles
        scratch_shapes=[
            pltpu.VMEM((1, gbs), jnp.float32),     # running segment max
            pltpu.VMEM((1, gbs), jnp.float32),     # running segment sum
            pltpu.VMEM((gbs, fp), jnp.float32),    # weighted-feature accumulator
        ],
    )

    out = pl.pallas_call(
        _node_to_bb_kernel,
        out_shape=jax.ShapeDtypeStruct((g_pad, fp), dtype),
        grid_spec=grid_spec,
        compiler_params=pltpu.CompilerParams(
            dimension_semantics=("parallel", "arbitrary"),
            vmem_limit_bytes=32 * 1024 * 1024,
        ),
        cost_estimate=cost,
    )(x_p, batch_p, w1_p, b1_p, w2_p, b2_p)

    return out[:num_segments, :f]


def _reference(x, batch, num_segments, params):
    w1, b1, w2, b2 = params
    h = jnp.maximum(x @ w1 + b1, 0.0)
    gate = jnp.sum(h * w2, axis=1) + b2[0, 0]                             # [N]
    seg_max = jax.ops.segment_max(gate, batch, num_segments=num_segments)
    seg_max = jnp.where(jnp.isfinite(seg_max), seg_max, 0.0)
    e = jnp.exp(gate - seg_max[batch])
    seg_sum = jax.ops.segment_sum(e, batch, num_segments=num_segments) + 1e-16
    gate_sm = e / seg_sum[batch]
    return jax.ops.segment_sum(gate_sm[:, None] * x, batch, num_segments=num_segments)


def _init_params(key, f):
    # deterministic synthetic init (mimics torch Linear uniform(+-1/sqrt(fan_in)))
    k1, k2, k3, k4 = jax.random.split(key, 4)
    bound = 1.0 / jnp.sqrt(f)
    w1 = jax.random.uniform(k1, (f, f), jnp.float32, -bound, bound)   # used as x @ W1
    b1 = jax.random.uniform(k2, (1, f), jnp.float32, -bound, bound)
    w2 = jax.random.uniform(k3, (1, f), jnp.float32, -bound, bound)   # Linear(F,1).weight
    b2 = jax.random.uniform(k4, (1, 1), jnp.float32, -bound, bound)
    return w1, b1, w2, b2


if __name__ == "__main__":
    key = jax.random.PRNGKey(0)
    kx, kp = jax.random.split(key)

    N, F, G = 16, 32, 2                      # nodes, feature size, basic blocks
    x = jax.random.normal(kx, (N, F), jnp.float32)
    # nodes 0..8 -> block 0, nodes 9..15 -> block 1
    batch = jnp.concatenate([jnp.zeros((9,), jnp.int32), jnp.ones((7,), jnp.int32)])
    params = _init_params(kp, F)

    out = node_to_basic_block_aggregate(x, batch, G, params)
    out = jax.block_until_ready(out)

    ref = _reference(x, batch, G, params)
    assert out.shape == (G, F)
    assert jnp.allclose(out, ref, atol=1e-5, rtol=1e-5), "mismatch vs pure-JAX reference"

    print("KERNEL_OK")
</pallas_src>

<mosaic_0001>
module attributes {stable_mosaic.version = 11 : i64} {
  func.func @_node_to_bb_kernel(%arg0: i32, %arg1: i32, %arg2: memref<16x128xf32, #tpu.memory_space<vmem>>, %arg3: memref<16x1xi32, #tpu.memory_space<vmem>>, %arg4: memref<128x128xf32, #tpu.memory_space<vmem>>, %arg5: memref<1x128xf32, #tpu.memory_space<vmem>>, %arg6: memref<1x128xf32, #tpu.memory_space<vmem>>, %arg7: memref<1x1xf32, #tpu.memory_space<smem>>, %arg8: memref<8x128xf32, #tpu.memory_space<vmem>>, %arg9: memref<1x8xf32, #tpu.memory_space<vmem>>, %arg10: memref<1x8xf32, #tpu.memory_space<vmem>>, %arg11: memref<8x128xf32, #tpu.memory_space<vmem>>) attributes {dimension_semantics = [#tpu.dimension_semantics<parallel>, #tpu.dimension_semantics<arbitrary>], iteration_bounds = array<i64: 1, 1>, scalar_prefetch = 0 : i64, scratch_operands = 3 : i64, tpu.core_type = #tpu.core_type<tc>, window_params = [{transform_indices = @transform_0, window_bounds = array<i64: 16, 128>}, {transform_indices = @transform_1, window_bounds = array<i64: 16, 1>}, {pipeline_mode = #tpu.pipeline_mode<synchronous>, transform_indices = @transform_2, window_bounds = array<i64: 128, 128>}, {pipeline_mode = #tpu.pipeline_mode<synchronous>, transform_indices = @transform_3, window_bounds = array<i64: 1, 128>}, {pipeline_mode = #tpu.pipeline_mode<synchronous>, transform_indices = @transform_4, window_bounds = array<i64: 1, 128>}, {transform_indices = @transform_5, window_bounds = array<i64: 1, 1>}, {transform_indices = @transform_6, window_bounds = array<i64: 8, 128>}]} {
    %c0_i32 = arith.constant 0 : i32
    %0 = arith.cmpi eq, %arg1, %c0_i32 : i32
    %1 = arith.extui %0 : i1 to i32
    %c0_i32_0 = arith.constant 0 : i32
    %2 = arith.cmpi ne, %1, %c0_i32_0 : i32
    scf.if %2 {
      %cst_35 = arith.constant 0xFF800000 : f32
      %68 = vector.broadcast %cst_35 : f32 to vector<1x8xf32>
      %c0_36 = arith.constant 0 : index
      %c0_37 = arith.constant 0 : index
      %69 = vector.load %arg9[%c0_36, %c0_37] : memref<1x8xf32, #tpu.memory_space<vmem>>, vector<1x8xf32>
      tpu.vector_store %arg9[%c0_36, %c0_37], %68 {strides = array<i32>} : memref<1x8xf32, #tpu.memory_space<vmem>>, vector<1x8xf32>,
      %cst_38 = arith.constant 0.000000e+00 : f32
      %70 = vector.broadcast %cst_38 : f32 to vector<1x8xf32>
      %c0_39 = arith.constant 0 : index
      %c0_40 = arith.constant 0 : index
      %71 = vector.load %arg10[%c0_39, %c0_40] : memref<1x8xf32, #tpu.memory_space<vmem>>, vector<1x8xf32>
      tpu.vector_store %arg10[%c0_39, %c0_40], %70 {strides = array<i32>} : memref<1x8xf32, #tpu.memory_space<vmem>>, vector<1x8xf32>,
      %cst_41 = arith.constant 0.000000e+00 : f32
      %72 = vector.broadcast %cst_41 : f32 to vector<8x128xf32>
      %c0_42 = arith.constant 0 : index
      %c0_43 = arith.constant 0 : index
      %73 = vector.load %arg11[%c0_42, %c0_43] : memref<8x128xf32, #tpu.memory_space<vmem>>, vector<8x128xf32>
      tpu.vector_store %arg11[%c0_42, %c0_43], %72 {strides = array<i32>} : memref<8x128xf32, #tpu.memory_space<vmem>>, vector<8x128xf32>,
    } else {
    }
    %c0 = arith.constant 0 : index
    %c0_1 = arith.constant 0 : index
    %3 = vector.load %arg2[%c0, %c0_1] : memref<16x128xf32, #tpu.memory_space<vmem>>, vector<16x128xf32>
    %c0_2 = arith.constant 0 : index
    %c0_3 = arith.constant 0 : index
    %4 = vector.load %arg4[%c0_2, %c0_3] : memref<128x128xf32, #tpu.memory_space<vmem>>, vector<128x128xf32>
    %cst = arith.constant dense<0.000000e+00> : vector<16x128xf32>
    %5 = tpu.matmul %3, %4, %cst {dimension_numbers = #tpu.dot_dimension_numbers<[1], [0], [0], [1], [0, 0, 1, 1], [], []>} : vector<16x128xf32>, vector<128x128xf32>, vector<16x128xf32> -> vector<16x128xf32>
    %c0_4 = arith.constant 0 : index
    %c0_5 = arith.constant 0 : index
    %6 = vector.load %arg5[%c0_4, %c0_5] : memref<1x128xf32, #tpu.memory_space<vmem>>, vector<1x128xf32>
    %7 = vector.broadcast %6 : vector<1x128xf32> to vector<16x128xf32>
    %8 = arith.addf %5, %7 : vector<16x128xf32>
    %cst_6 = arith.constant 0.000000e+00 : f32
    %9 = vector.broadcast %cst_6 : f32 to vector<16x128xf32>
    %10 = arith.maximumf %8, %9 : vector<16x128xf32>
    %c0_7 = arith.constant 0 : index
    %c0_8 = arith.constant 0 : index
    %11 = vector.load %arg6[%c0_7, %c0_8] : memref<1x128xf32, #tpu.memory_space<vmem>>, vector<1x128xf32>
    %12 = vector.broadcast %11 : vector<1x128xf32> to vector<16x128xf32>
    %13 = arith.mulf %10, %12 : vector<16x128xf32>
    %cst_9 = arith.constant dense<0.000000e+00> : vector<16xf32>
    %14 = vector.multi_reduction <add>, %13, %cst_9 [1] : vector<16x128xf32> to vector<16xf32>
    %15 = vector.shape_cast %14 : vector<16xf32> to vector<16x1xf32>
    %c0_10 = arith.constant 0 : index
    %c0_11 = arith.constant 0 : index
    %16 = memref.load %arg7[%c0_10, %c0_11] : memref<1x1xf32, #tpu.memory_space<smem>>
    %17 = vector.broadcast %16 : f32 to vector<16x1xf32>
    %18 = arith.addf %15, %17 : vector<16x1xf32>
    %c8_i32 = arith.constant 8 : i32
    %19 = arith.muli %arg0, %c8_i32 : i32
    %20 = tpu.iota {dimensions = array<i32: 1>} : vector<16x8xi32>
    %21 = vector.broadcast %19 : i32 to vector<16x8xi32>
    %22 = arith.addi %21, %20 : vector<16x8xi32>
    %c0_12 = arith.constant 0 : index
    %c0_13 = arith.constant 0 : index
    %23 = vector.load %arg3[%c0_12, %c0_13] : memref<16x1xi32, #tpu.memory_space<vmem>>, vector<16x1xi32>
    %24 = vector.broadcast %23 : vector<16x1xi32> to vector<16x8xi32>
    %25 = arith.cmpi eq, %24, %22 : vector<16x8xi32>
    %cst_14 = arith.constant 0xFF800000 : f32
    %26 = vector.shape_cast %18 : vector<16x1xf32> to vector<16x1xf32>
    %27 = vector.broadcast %26 : vector<16x1xf32> to vector<16x8xf32>
    %28 = vector.broadcast %cst_14 : f32 to vector<16x8xf32>
    %29 = arith.select %25, %27, %28 : vector<16x8xi1>, vector<16x8xf32>
    %c0_15 = arith.constant 0 : index
    %c0_16 = arith.constant 0 : index
    %30 = vector.load %arg9[%c0_15, %c0_16] : memref<1x8xf32, #tpu.memory_space<vmem>>, vector<1x8xf32>
    %cst_17 = arith.constant dense<0xFF800000> : vector<8xf32>
    %31 = vector.multi_reduction <maximumf>, %29, %cst_17 [0] : vector<16x8xf32> to vector<8xf32>
    %32 = vector.shape_cast %31 : vector<8xf32> to vector<1x8xf32>
    %33 = arith.maximumf %30, %32 : vector<1x8xf32>
    %cst_18 = arith.constant 0xFF800000 : f32
    %34 = vector.broadcast %cst_18 : f32 to vector<1x8xf32>
    %35 = arith.cmpf oeq, %33, %34 : vector<1x8xf32>
    %cst_19 = arith.constant 0.000000e+00 : f32
    %36 = vector.broadcast %cst_19 : f32 to vector<1x8xf32>
    %37 = arith.select %35, %36, %33 : vector<1x8xi1>, vector<1x8xf32>
    %38 = vector.broadcast %37 : vector<1x8xf32> to vector<16x8xf32>
    %39 = arith.subf %29, %38 : vector<16x8xf32>
    %40 = math.exp %39 : vector<16x8xf32>
    %41 = arith.subf %30, %37 : vector<1x8xf32>
    %42 = math.exp %41 : vector<1x8xf32>
    %43 = tpu.iota {dimensions = array<i32: 0>} : vector<8x8xi32>
    %44 = tpu.iota {dimensions = array<i32: 1>} : vector<8x8xi32>
    %45 = arith.cmpi eq, %43, %44 : vector<8x8xi32>
    %46 = arith.extui %45 : vector<8x8xi1> to vector<8x8xi32>
    %47 = arith.sitofp %46 : vector<8x8xi32> to vector<8x8xf32>
    %48 = vector.broadcast %42 : vector<1x8xf32> to vector<8x8xf32>
    %49 = arith.mulf %47, %48 : vector<8x8xf32>
    %cst_20 = arith.constant dense<0.000000e+00> : vector<8xf32>
    %50 = vector.multi_reduction <add>, %49, %cst_20 [1] : vector<8x8xf32> to vector<8xf32>
    %51 = vector.shape_cast %50 : vector<8xf32> to vector<8x1xf32>
    %c0_21 = arith.constant 0 : index
    %c0_22 = arith.constant 0 : index
    %52 = vector.load %arg10[%c0_21, %c0_22] : memref<1x8xf32, #tpu.memory_space<vmem>>, vector<1x8xf32>
    %53 = arith.mulf %42, %52 : vector<1x8xf32>
    %cst_23 = arith.constant dense<0.000000e+00> : vector<8xf32>
    %54 = vector.multi_reduction <add>, %40, %cst_23 [0] : vector<16x8xf32> to vector<8xf32>
    %55 = vector.shape_cast %54 : vector<8xf32> to vector<1x8xf32>
    %56 = arith.addf %53, %55 : vector<1x8xf32>
    %c0_24 = arith.constant 0 : index
    %c0_25 = arith.constant 0 : index
    %57 = vector.load %arg10[%c0_24, %c0_25] : memref<1x8xf32, #tpu.memory_space<vmem>>, vector<1x8xf32>
    tpu.vector_store %arg10[%c0_24, %c0_25], %56 {strides = array<i32>} : memref<1x8xf32, #tpu.memory_space<vmem>>, vector<1x8xf32>,
    %c0_26 = arith.constant 0 : index
    %c0_27 = arith.constant 0 : index
    %58 = vector.load %arg11[%c0_26, %c0_27] : memref<8x128xf32, #tpu.memory_space<vmem>>, vector<8x128xf32>
    %59 = vector.broadcast %51 : vector<8x1xf32> to vector<8x128xf32>
    %60 = arith.mulf %59, %58 : vector<8x128xf32>
    %cst_28 = arith.constant dense<0.000000e+00> : vector<8x128xf32>
    %61 = tpu.matmul %40, %3, %cst_28 {dimension_numbers = #tpu.dot_dimension_numbers<[0], [0], [1], [1], [0, 1, 1, 1], [], []>} : vector<16x8xf32>, vector<16x128xf32>, vector<8x128xf32> -> vector<8x128xf32>
    %62 = arith.addf %60, %61 : vector<8x128xf32>
    %c0_29 = arith.constant 0 : index
    %c0_30 = arith.constant 0 : index
    %63 = vector.load %arg11[%c0_29, %c0_30] : memref<8x128xf32, #tpu.memory_space<vmem>>, vector<8x128xf32>
    tpu.vector_store %arg11[%c0_29, %c0_30], %62 {strides = array<i32>} : memref<8x128xf32, #tpu.memory_space<vmem>>, vector<8x128xf32>,
    %c0_31 = arith.constant 0 : index
    %c0_32 = arith.constant 0 : index
    %64 = vector.load %arg9[%c0_31, %c0_32] : memref<1x8xf32, #tpu.memory_space<vmem>>, vector<1x8xf32>
    tpu.vector_store %arg9[%c0_31, %c0_32], %33 {strides = array<i32>} : memref<1x8xf32, #tpu.memory_space<vmem>>, vector<1x8xf32>,
    %c0_i32_33 = arith.constant 0 : i32
    %65 = arith.cmpi eq, %arg1, %c0_i32_33 : i32
    %66 = arith.extui %65 : i1 to i32
    %c0_i32_34 = arith.constant 0 : i32
    %67 = arith.cmpi ne, %66, %c0_i32_34 : i32
    scf.if %67 {
      %c0_35 = arith.constant 0 : index
      %c0_36 = arith.constant 0 : index
      %68 = vector.load %arg10[%c0_35, %c0_36] : memref<1x8xf32, #tpu.memory_space<vmem>>, vector<1x8xf32>
      %cst_37 = arith.constant 1.000000e-16 : f32
      %69 = vector.broadcast %cst_37 : f32 to vector<1x8xf32>
      %70 = arith.addf %68, %69 : vector<1x8xf32>
      %71 = vector.broadcast %70 : vector<1x8xf32> to vector<8x8xf32>
      %72 = arith.mulf %47, %71 : vector<8x8xf32>
      %cst_38 = arith.constant dense<0.000000e+00> : vector<8xf32>
      %73 = vector.multi_reduction <add>, %72, %cst_38 [1] : vector<8x8xf32> to vector<8xf32>
      %74 = vector.shape_cast %73 : vector<8xf32> to vector<8x1xf32>
      %c0_39 = arith.constant 0 : index
      %c0_40 = arith.constant 0 : index
      %75 = vector.load %arg11[%c0_39, %c0_40] : memref<8x128xf32, #tpu.memory_space<vmem>>, vector<8x128xf32>
      %76 = vector.broadcast %74 : vector<8x1xf32> to vector<8x128xf32>
      %77 = arith.divf %75, %76 : vector<8x128xf32>
      %c0_41 = arith.constant 0 : index
      %c0_42 = arith.constant 0 : index
      %78 = vector.load %arg8[%c0_41, %c0_42] : memref<8x128xf32, #tpu.memory_space<vmem>>, vector<8x128xf32>
      tpu.vector_store %arg8[%c0_41, %c0_42], %77 {strides = array<i32>} : memref<8x128xf32, #tpu.memory_space<vmem>>, vector<8x128xf32>,
    } else {
    }
    return
  }
  func.func @transform_0(%arg0: i32, %arg1: i32) -> (i32, i32) {
    %c0_i32 = arith.constant 0 : i32
    %c0_i32_0 = arith.constant 0 : i32
    return %arg1, %c0_i32 : i32, i32
  }
  func.func @transform_1(%arg0: i32, %arg1: i32) -> (i32, i32) {
    %c0_i32 = arith.constant 0 : i32
    %c0_i32_0 = arith.constant 0 : i32
    return %arg1, %c0_i32 : i32, i32
  }
  func.func @transform_2(%arg0: i32, %arg1: i32) -> (i32, i32) {
    %c0_i32 = arith.constant 0 : i32
    %c0_i32_0 = arith.constant 0 : i32
    %c0_i32_1 = arith.constant 0 : i32
    return %c0_i32, %c0_i32_0 : i32, i32
  }
  func.func @transform_3(%arg0: i32, %arg1: i32) -> (i32, i32) {
    %c0_i32 = arith.constant 0 : i32
    %c0_i32_0 = arith.constant 0 : i32
    %c0_i32_1 = arith.constant 0 : i32
    return %c0_i32, %c0_i32_0 : i32, i32
  }
  func.func @transform_4(%arg0: i32, %arg1: i32) -> (i32, i32) {
    %c0_i32 = arith.constant 0 : i32
    %c0_i32_0 = arith.constant 0 : i32
    %c0_i32_1 = arith.constant 0 : i32
    return %c0_i32, %c0_i32_0 : i32, i32
  }
  func.func @transform_5(%arg0: i32, %arg1: i32) -> (i32, i32) {
    %c0_i32 = arith.constant 0 : i32
    %c0_i32_0 = arith.constant 0 : i32
    %c0_i32_1 = arith.constant 0 : i32
    return %c0_i32, %c0_i32_0 : i32, i32
  }
  func.func @transform_6(%arg0: i32, %arg1: i32) -> (i32, i32) {
    %c0_i32 = arith.constant 0 : i32
    %c0_i32_0 = arith.constant 0 : i32
    return %arg0, %c0_i32 : i32, i32
  }
}

</mosaic_0001>

<bundles_post_ra>
// kernel: tpu_custom_call.1
= control target key start
LH: loop header
LB: loop body
LE: loop exit
PB: predicated region body
PF: predicated region fallthrough
CT: control target
= control target key end

     0   :  { %12 = vsyncpa [#allocation7], 0  ;;  %s454_s0 = inlined_call_operand.vmem [shape: f32[16,128], index: 0, kind: input, shape index: {}]   ;;  %s455_s1 = inlined_call_operand.vmem [shape: s32[16,1], index: 1, kind: input, shape index: {}]   ;;  %s456_s2 = inlined_call_operand.hbm [shape: f32[128,128], index: 2, kind: input, shape index: {}]   ;;  %s457_s3 = inlined_call_operand.vmem [shape: f32[1,128], index: 3, kind: input, shape index: {}]   ;;  %s458_s4 = inlined_call_operand.vmem [shape: f32[1,128], index: 4, kind: input, shape index: {}]   ;;  %s459_s5 = inlined_call_operand.<no memory space> [shape: f32[1,1], index: 5, kind: input, shape index: {}]   ;;  %s460_s6 = inlined_call_operand.hbm [shape: f32[8,128], index: 6, kind: output, shape index: {}]  }
   0x1   :  { %13 = vsyncpa [#allocation8], 0  ;;  %s22_s23 = sshll.u32 %s456_s2, 4  ;;  %s375_s24 = smov [#allocation6]   ;;  %s23_s23 = int_to_ptr.hbm [resolvable:$true] %s22_s23 }
   0x2   :  { %s24_s25 = sshll.u32 %s375_s24, 4  ;;  %s376_s26 = smov 128   ;;  %s25_s25 = int_to_ptr.vmem [resolvable:$true] %s24_s25 }
   0x3   :  { %s377_s27 = smov 8  }
   0x4   :  { %30 = dma.hbm_to_vmem [thread:$0]  %s23_s23, 2048, %s25_s25, [#allocation7], %s376_s26, %s376_s26, %s377_s27  }
   0x5   :  { %371 = dma.done.wait [#allocation7], 2048  }
   0x6   :  { %372 = vsyncadd [#allocation7], 4294965248  ;;  %v66_v0 = vld [vmem:[#allocation6 + $0x78] sm:$0xff]  ;;  %v65_v1 = vld [vmem:[#allocation6 + $0x70] sm:$0xff]  ;;  %v378_v3 = vmov 0   ;;  %vm45_vm0 = vcmask 57344   ;;  %v111_v33 = vlaneseq  ;;  %v107_v36 = vstv %s459_s5 }
   0x7   :  { %71 = vmatpush.msra.mxu0 %v66_v0  ;;  %288 = vmatpush.msra.mxu2 %v66_v0  ;;  %v64_v2 = vld [vmem:[#allocation6 + $0x68] sm:$0xff]  ;;  %v63_v4 = vld [vmem:[#allocation6 + $0x60] sm:$0xff]  ;;  %v62_v6 = vld [vmem:[#allocation6 + $0x58] sm:$0xff]  ;;  %v379_v31 = vmov -inf   ;;  %v380_v37 = vmov 0.0   ;;  %vm128_vm2 = vcmask 64512  }
   0x8   :  { %311 = vset.pattern.permute.xlu1 %v378_v3  ;;  %312 = vset.pattern.permute.xlu0 %v378_v3  ;;  %v50_v5 = vld [vmem:[%s454_s0 + $0x8] sm:$0xff]  ;;  %v49_v7 = vld [vmem:[%s454_s0] sm:$0xff]  ;;  %v61_v8 = vld [vmem:[#allocation6 + $0x50] sm:$0xff]  ;;  %46 = vst.msk [vmem:[#allocation2] sm:$0x1] %vm45_vm0, %v379_v31  ;;  %v112_v35 = vand.u32 127, %v111_v33 }
   0x9   :  { %72 = vmatpush.msra.mxu0 %v65_v1  ;;  %289 = vmatpush.msra.mxu2 %v65_v1  ;;  %v60_v9 = vld [vmem:[#allocation6 + $0x48] sm:$0xff]  ;;  %v59_v10 = vld [vmem:[#allocation6 + $0x40] sm:$0xff]  ;;  %v58_v11 = vld [vmem:[#allocation6 + $0x38] sm:$0xff]  ;;  %47 = vst.msk [vmem:[#allocation3] sm:$0x1] %vm45_vm0, %v380_v37  ;;  %v154_v61 = vshrl.u32 %v111_v33, 7 }
   0xa   :  { %231 = vmatpush.msra.mxu1 %v50_v5  ;;  %v57_v12 = vld [vmem:[#allocation6 + $0x30] sm:$0xff]  ;;  %v56_v13 = vld [vmem:[#allocation6 + $0x28] sm:$0xff]  ;;  %v55_v14 = vld [vmem:[#allocation6 + $0x20] sm:$0xff]  ;;  %vm213_vm6 = vcmask 130048   ;;  %s276_s16 = sshll.u32 %s460_s6, 4  ;;  %s277_s16 = int_to_ptr.hbm [resolvable:$true] %s276_s16 }
   0xb   :  { %73 = vmatpush.msra.mxu0 %v64_v2  ;;  %290 = vmatpush.msra.mxu2 %v64_v2  ;;  %v54_v15 = vld [vmem:[#allocation6 + $0x18] sm:$0xff]  ;;  %v53_v16 = vld [vmem:[#allocation6 + $0x10] sm:$0xff]  ;;  %v52_v17 = vld [vmem:[#allocation6 + $0x8] sm:$0xff]  ;;  %vm155_vm5 = vcmp.eq.s32.totalorder %v154_v61, %v112_v35 }
   0xc   :  { %232 = vmatpush.msra.mxu1 %v49_v7  ;;  %v51_v18 = vld [vmem:[#allocation6] sm:$0xff]  ;;  %v313_v21 = vld [vmem:[%s457_s3] ss:$0 sm:$0xff]  ;;  %v286_v1 = vsel %vm155_vm5, 1.0, %v380_v37 }
   0xd   :  { %74 = vmatpush.msra.mxu0 %v63_v4  ;;  %291 = vmatpush.msra.mxu2 %v63_v4  ;;  %v115_v19 = vld [vmem:[%s455_s1] sm:$0xff]  ;;  %v116_v20 = vld [vmem:[%s455_s1 + $0x8] sm:$0xff] }
   0xe   :  { %118 = vperm.xlu1 %311, %v115_v19   ;;  %v314_v24 = vld [vmem:[%s458_s4] ss:$0 sm:$0xff]  ;;  %s381_s4 = smov [#allocation9]  }
   0xf   :  { %75 = vmatpush.msra.mxu0 %v62_v6  ;;  %292 = vmatpush.msra.mxu2 %v62_v6  ;;  %v127_v52 = vld [vmem:[#allocation2] sm:$0x1]  ;;  %s274_s5 = sshll.u32 %s381_s4, 4  ;;  %s275_s5 = int_to_ptr.vmem [resolvable:$true] %s274_s5 }
  0x11   :  { %76 = vmatpush.msra.mxu0 %v61_v8  ;;  %293 = vmatpush.msra.mxu2 %v61_v8 }
  0x13   :  { %77 = vmatpush.msra.mxu0 %v60_v9  ;;  %294 = vmatpush.msra.mxu2 %v60_v9 }
  0x15   :  { %78 = vmatpush.msra.mxu0 %v59_v10  ;;  %295 = vmatpush.msra.mxu2 %v59_v10 }
  0x16   :  { %121 = vperm.xlu1 %311, %v116_v20  }
  0x17   :  { %79 = vmatpush.msra.mxu0 %v58_v11  ;;  %296 = vmatpush.msra.mxu2 %v58_v11 }
  0x19   :  { %80 = vmatpush.msra.mxu0 %v57_v12  ;;  %297 = vmatpush.msra.mxu2 %v57_v12 }
  0x1b   :  { %81 = vmatpush.msra.mxu0 %v56_v13  ;;  %298 = vmatpush.msra.mxu2 %v56_v13 }
  0x1d   :  { %82 = vmatpush.msra.mxu0 %v55_v14  ;;  %299 = vmatpush.msra.mxu2 %v55_v14  ;;  %v165_v14 = vld [vmem:[#allocation3] sm:$0x1] }
  0x1f   :  { %83 = vmatpush.msra.mxu0 %v54_v15  ;;  %300 = vmatpush.msra.mxu2 %v54_v15 }
  0x21   :  { %84 = vmatpush.msra.mxu0 %v53_v16  ;;  %301 = vmatpush.msra.mxu2 %v53_v16 }
  0x23   :  { %85 = vmatpush.msra.mxu0 %v52_v17  ;;  %302 = vmatpush.msra.mxu2 %v52_v17 }
  0x25   :  { %86 = vmatpush.msra.mxu0 %v51_v18  ;;  %303 = vmatpush.msra.mxu2 %v51_v18 }
  0x26   :  { %87 = vmatmul.f32.vlgmr.msra.gmra.mxu0 %v49_v7  ;;  %90 = vmatmul.f32.vlgmr.msra.gmra.mxu2 %v50_v5 }
  0x80   :  { %v119_v32 = vpop.permute.xlu1 %118 }
  0x81   :  { %vm123_vm1 = vcmp.eq.s32.totalorder %v119_v32, %v112_v35 }
  0x88   :  { %v122_v39 = vpop.permute.xlu1 %121 }
  0x89   :  { %vm124_vm3 = vcmp.eq.s32.totalorder %v122_v39, %v112_v35 }
  0xa3   :  { %v88_v22 = vpop.f32.mrf.mxu0 }
  0xa4   :  { %v89_v23 = vadd.f32 %v313_v21, %v88_v22 }
  0xa6   :  { %v94_v25 = vmax.f32 %v89_v23, 0.0 }
  0xa8   :  { %v100_v26 = vmul.f32 %v314_v24, %v94_v25 }
  0xa9   :  { %v91_v27 = vpop.f32.mrf.mxu2 }
  0xaa   :  { %102 = vadd.xlane.f32.xlu0 %v100_v26  ;;  %v92_v28 = vadd.f32 %v313_v21, %v91_v27 }
  0xac   :  { %v95_v29 = vmax.f32 %v92_v28, 0.0 }
  0xae   :  { %v101_v30 = vmul.f32 %v314_v24, %v95_v29 }
  0xb2   :  { %104 = vadd.xlane.f32.xlu0 %v101_v30 }
 0x11d   :  { %v103_v34 = vpop.xlane.xlu0 %102 }
 0x11e   :  { %v108_v38 = vadd.f32 %v107_v36, %v103_v34 }
 0x120   :  { %v125_v41 = vsel %vm123_vm1, %v108_v38, -inf }
 0x121   :  { %v129_v44 = vsel %vm128_vm2, %v125_v41, -inf }
 0x125   :  { %v105_v40 = vpop.xlane.xlu0 %104 }
 0x126   :  { %v109_v42 = vadd.f32 %v107_v36, %v105_v40 }
 0x128   :  { %v126_v43 = vsel %vm124_vm3, %v109_v42, -inf }
 0x129   :  { %v130_v45 = vsel %vm128_vm2, %v126_v43, -inf }
 0x12a   :  { %v131_v46 = vmax.f32 %v129_v44, %v130_v45 }
 0x12c   :  { %v132_v47 = vrot.slane %v131_v46, 4 }
 0x12e   :  { %v133_v48 = vmax.f32 %v131_v46, %v132_v47 }
 0x130   :  { %v134_v49 = vrot.slane %v133_v48, 2 }
 0x132   :  { %v135_v50 = vmax.f32 %v133_v48, %v134_v49 }
 0x134   :  { %v136_v51 = vrot.slane %v135_v50, 1 }
 0x136   :  { %v137_v53 = vmax.f32 %v135_v50, %v136_v51 }
 0x138   :  { %v138_v54 = vmax.f32 %v127_v52, %v137_v53 }
 0x13a   :  { %vm139_vm4 = vcmp.eq.f32.partialorder %v138_v54, -inf  ;;  %239 = vst.msk [vmem:[#allocation2] sm:$0x1] %vm45_vm0, %v138_v54 }
 0x13b   :  { %v140_v55 = vsel %vm139_vm4, 0.0, %v138_v54 }
 0x13c   :  { %v142_v56 = vperm.slane %v140_v55, 0  ;;  %v150_v57 = vsub.f32 %v127_v52, %v140_v55 }
 0x13e   :  { %v145_v58 = vsub.f32 %v126_v43, %v142_v56  ;;  %v151_v59 = vmul.f32 1.442695, %v150_v57  ;;  %v144_v60 = vsub.f32 %v125_v41, %v142_v56 }
 0x140   :  { %v148_v62 = vmul.f32 1.442695, %v145_v58  ;;  %315 = vpow2.f32 %v151_v59  ;;  %v146_v63 = vmul.f32 1.442695, %v144_v60 }
 0x142   :  { %317 = vpow2.f32 %v148_v62 }
 0x143   :  { %319 = vpow2.f32 %v146_v63 }
 0x146   :  { %v316_v0 = vpop.eup %315 }
 0x147   :  { %v159_v2 = vperm.slane %v316_v0, 0  ;;  %v166_v17 = vmul.f32 %v316_v0, %v165_v14 }
 0x148   :  { %v318_v3 = vpop.eup %317 }
 0x149   :  { %v320_v4 = vpop.eup %319  ;;  %v168_v5 = vsel %vm128_vm2, %v318_v3, 0.0  ;;  %v161_v6 = vmul.f32 %v286_v1, %v159_v2 }
 0x14a   :  { %181 = vxpose.xlu2.b32.start [1/2] (short) (narrow) %v320_v4, 8  ;;  %v167_v7 = vsel %vm128_vm2, %v320_v4, 0.0 }
 0x14b   :  { %v169_v8 = vadd.f32 %v168_v5, %v167_v7  ;;  %v162_v9 = vsel %vm128_vm2, %v161_v6, 0.0 }
 0x14c   :  { %163 = vadd.xlane.f32.xlu1 %v162_v9 }
 0x14d   :  { %v170_v10 = vrot.slane %v169_v8, 4 }
 0x14f   :  { %v171_v11 = vadd.f32 %v170_v10, %v169_v8 }
 0x151   :  { %v172_v12 = vrot.slane %v171_v11, 2 }
 0x152   :  { %182 = vxpose.xlu2.b32.end [2/2] (short) (narrow) %v318_v3, 8 }
 0x153   :  { %v173_v13 = vadd.f32 %v172_v12, %v171_v11 }
 0x155   :  { %v174_v15 = vrot.slane %v173_v13, 1 }
 0x157   :  { %v175_v16 = vadd.f32 %v174_v15, %v173_v13 }
 0x159   :  { %v176_v18 = vadd.f32 %v175_v16, %v166_v17 }
 0x15b   :  { %178 = vst.msk [vmem:[#allocation3] sm:$0x1] %vm45_vm0, %v176_v18 }
 0x162   :  { %v243_v19 = vld [vmem:[#allocation3] sm:$0x1] }
 0x163   :  { %v244_v20 = vadd.f32 1e-16, %v243_v19 }
 0x165   :  { %v246_v21 = vperm.slane %v244_v20, 0 }
 0x167   :  { %v248_v22 = vmul.f32 %v286_v1, %v246_v21 }
 0x169   :  { %v249_v23 = vsel %vm128_vm2, %v248_v22, 0.0 }
 0x16a   :  { %250 = vadd.xlane.f32.xlu0 %v249_v23 }
 0x1bf   :  { %v164_v31 = vpop.xlane.xlu1 %163 }
 0x1c0   :  { %v180_v34 = vmul.f32 0.0, %v164_v31 }
 0x1dd   :  { %v251_v25 = vpop.xlane.xlu0 %250 }
 0x1de   :  { %321 = vrcp.f32 %v251_v25  ;;  %v264_v32 = vand.u32 2147483648, %v251_v25  ;;  %vm258_vm8 = vweird.f32 %v251_v25  ;;  %v262_v33 = vand.u32 2147483647, %v251_v25 }
 0x1e0   :  { %v265_v36 = vor.u32 1.1754944e-38, %v264_v32  ;;  %vm263_vm10 = vcmp.eq.f32.partialorder %v262_v33, 8.507059e+37 }
 0x1e3   :  { %v197_v24 = vpop.trf.xlu2 }
 0x1e4   :  { %287 = vmatmul.msk.f32.vlgmr.msra.gmra.mxu1 %vm213_vm6, %v197_v24  ;;  %v322_v26 = vpop.eup %321 }
 0x1e5   :  { %v254_v27 = vmul.f32 %v322_v26, %v251_v25  ;;  %vm259_vm7 = vweird.f32 %v322_v26 }
 0x1e6   :  { %vm260_vm9 = vmor %vm258_vm8, %vm259_vm7 }
 0x1e7   :  { %v255_v28 = vsub.f32 1.0, %v254_v27 }
 0x1e9   :  { %v256_v29 = vmul.f32 %v322_v26, %v255_v28 }
 0x1eb   :  { %v257_v30 = vadd.f32 %v322_v26, %v256_v29 }
 0x1ed   :  { %v261_v35 = vsel %vm260_vm9, %v322_v26, %v257_v30 }
 0x1ee   :  { %v266_v39 = vsel %vm263_vm10, %v265_v36, %v261_v35 }
 0x261   :  { %v234_v37 = vpop.f32.mrf.mxu1 }
 0x262   :  { %v237_v38 = vadd.f32 %v234_v37, %v180_v34 }
 0x264   :  { %v267_v40 = vmul.f32 %v266_v39, %v237_v38 }
 0x266   :  { %268 = vst [vmem:[#allocation9] sm:$0xff] %v267_v40 }
 0x267   :  { %279 = dma.vmem_to_hbm [thread:$0]  %s275_s5, 128, %s277_s16, [#allocation8]  }
 0x268   :  { %373 = dma.done.wait [#allocation8], 128  }
 0x269   :  { %374 = vsyncadd [#allocation8], 4294967168 }
 0x26a   :  { %284 = vsyncpa [#allocation7], 1 }
 0x26b   :  { %285 = vsyncpa [#allocation8], 1 }

</bundles_post_ra>
